<compile_context>
chip_gen: v7x
topology: tpu7x:2x2x1
jax: 0.10.0
libtpu: 0.0.40
codegen_flags: <defaults>
</compile_context>

<pallas_src>
from functools import partial

import jax
import jax.numpy as jnp
from jax import lax
from jax.experimental import pallas as pl
from jax.experimental.pallas import tpu as pltpu

EPS = 1e-5


def _round8(n):
    return ((n + 7) // 8) * 8


def _pad_axis(a, axis, target):
    if a.shape[axis] == target:
        return a
    widths = [(0, 0)] * a.ndim
    widths[axis] = (0, target - a.shape[axis])
    return jnp.pad(a, widths)


# ---------------------------------------------------------------------------
# Fused Pallas kernel (one grid step = one image)
# ---------------------------------------------------------------------------
def _block_kernel(mask_ref, x_ref, w1_ref, b1_ref, w2_ref, b2_ref, o_ref, *,
                  H, W):
    """Fused conv1+BN1+ReLU -> conv2+BN2 + shortcut(1x1+BN) -> add -> ReLU.

    mask_ref: (9, HW)                 boundary masks for each 3x3 tap
    x_ref:    (1, Cin_p, HW)          channels-first flattened input
    w1_ref:   (Cout_p, 9*Cin_p)       conv1 weights, BN1 scale folded in
    b1_ref:   (Cout_p, 1)             BN1 bias (conv bias folded in)
    w2_ref:   (Cout_p, 9*Cout_p+Cin_p) [conv2 | shortcut] weights, scales folded
    b2_ref:   (Cout_p, 1)             combined BN2 + shortcut-BN bias
    o_ref:    (1, Cout_p, HW)
    """
    HW = H * W
    x = x_ref[0]                      # (Cin_p, HW), lane-dense
    masks = mask_ref[...]             # (9, HW)

    def taps(a):
        # Build the 9 shifted views of a (C, HW) map as one (9*C, HW) array.
        parts = []
        k = 0
        for dy in (-1, 0, 1):
            for dx in (-1, 0, 1):
                off = dy * W + dx
                if off == 0:
                    parts.append(a)                     # centre tap: mask == 1
                else:
                    shifted = pltpu.roll(a, (-off) % HW, 1)
                    parts.append(shifted * masks[k:k + 1, :])
                k += 1
        return jnp.concatenate(parts, axis=0)           # (9*C, HW)

    # Stage 1: conv1(3x3) + BN1 + ReLU, as a single K=9*Cin matmul.
    h = jnp.dot(w1_ref[...], taps(x), preferred_element_type=jnp.float32)
    h = jnp.maximum(h + b1_ref[...], 0.0)               # (Cout_p, HW)

    # Stage 2: conv2(3x3)+BN2 and 1x1-shortcut+BN fused into one matmul.
    t2 = jnp.concatenate([taps(h), x], axis=0)          # (9*Cout_p + Cin_p, HW)
    y = jnp.dot(w2_ref[...], t2, preferred_element_type=jnp.float32)
    y = jnp.maximum(y + b2_ref[...], 0.0)
    o_ref[0] = y.astype(o_ref.dtype)


# ---------------------------------------------------------------------------
# Parameter folding + pallas_call wrapper
# ---------------------------------------------------------------------------
def _fold_bn(gamma, beta, rmean, rvar, conv_bias=None):
    scale = gamma / jnp.sqrt(rvar + EPS)
    bias = beta - rmean * scale
    if conv_bias is not None:
        bias = bias + conv_bias * scale
    return scale, bias


def _conv3x3_weight(w_oihw, scale, cin_p, cout_p):
    """torch (O, I, 3, 3) -> (Cout_p, 9*Cin_p) with BN scale folded in."""
    O, I = w_oihw.shape[0], w_oihw.shape[1]
    w = jnp.transpose(w_oihw, (0, 2, 3, 1)).reshape(O, 9, I)  # [o, 3*ky+kx, i]
    w = _pad_axis(w, 2, cin_p) * scale[:, None, None]
    w = w.reshape(O, 9 * cin_p)
    return _pad_axis(w, 0, cout_p)


def block_forward(x_nchw, p):
    """Pallas forward pass of Block. Input/output NCHW float32 (eval-mode BN)."""
    x_nchw = x_nchw.astype(jnp.float32)
    B, Cin, H, W = x_nchw.shape
    Cout = p["w1"].shape[0]
    HW = H * W
    Cin_p, Cout_p = _round8(Cin), _round8(Cout)

    # Fold BN (running statistics) into per-channel scale/bias.
    s1, b1 = _fold_bn(p["g1"], p["be1"], p["rm1"], p["rv1"], p["b1"])
    s2, b2 = _fold_bn(p["g2"], p["be2"], p["rm2"], p["rv2"], p["b2"])
    ss, bs = _fold_bn(p["gs"], p["bes"], p["rms"], p["rvs"], None)

    w1k = _conv3x3_weight(p["w1"], s1, Cin_p, Cout_p)          # (Cout_p, 9*Cin_p)
    w2k = _conv3x3_weight(p["w2"], s2, Cout_p, Cout_p)         # (Cout_p, 9*Cout_p)
    wsk = _pad_axis(p["ws"].reshape(Cout, Cin), 1, Cin_p) * ss[:, None]
    wsk = _pad_axis(wsk, 0, Cout_p)                            # (Cout_p, Cin_p)
    w2full = jnp.concatenate([w2k, wsk], axis=1)               # (Cout_p, 9*Cout_p+Cin_p)

    b1v = _pad_axis(b1, 0, Cout_p).reshape(Cout_p, 1)
    b2v = _pad_axis(b2 + bs, 0, Cout_p).reshape(Cout_p, 1)

    # Boundary masks for the in-kernel tap formation (same-padded 3x3).
    row = jnp.arange(H)[:, None]
    col = jnp.arange(W)[None, :]
    masks = []
    for dy in (-1, 0, 1):
        for dx in (-1, 0, 1):
            m = ((row + dy >= 0) & (row + dy < H) &
                 (col + dx >= 0) & (col + dx < W))
            masks.append(m.reshape(HW))
    masks = jnp.stack(masks, axis=0).astype(jnp.float32)       # (9, HW)

    # Channels-first flattened input: free reshape from NCHW.
    x_cf = _pad_axis(x_nchw.reshape(B, Cin, HW), 1, Cin_p)     # (B, Cin_p, HW)

    out = pl.pallas_call(
        partial(_block_kernel, H=H, W=W),
        out_shape=jax.ShapeDtypeStruct((B, Cout_p, HW), jnp.float32),
        grid=(B,),
        in_specs=[
            pl.BlockSpec((9, HW), lambda b: (0, 0)),
            pl.BlockSpec((1, Cin_p, HW), lambda b: (b, 0, 0)),
            pl.BlockSpec(w1k.shape, lambda b: (0, 0)),
            pl.BlockSpec(b1v.shape, lambda b: (0, 0)),
            pl.BlockSpec(w2full.shape, lambda b: (0, 0)),
            pl.BlockSpec(b2v.shape, lambda b: (0, 0)),
        ],
        out_specs=pl.BlockSpec((1, Cout_p, HW), lambda b: (b, 0, 0)),
        compiler_params=pltpu.CompilerParams(
            dimension_semantics=("parallel",)),
    )(masks, x_cf, w1k, b1v, w2full, b2v)

    return out[:, :Cout, :].reshape(B, Cout, H, W)             # NCHW


# ---------------------------------------------------------------------------
# Pure-JAX reference (mirrors the PyTorch forward, eval-mode BN)
# ---------------------------------------------------------------------------
def block_reference(x_nchw, p):
    x = jnp.transpose(x_nchw, (0, 2, 3, 1)).astype(jnp.float32)
    dn = ("NHWC", "HWIO", "NHWC")

    def conv(inp, w_oihw, stride=1):
        w = jnp.transpose(w_oihw, (2, 3, 1, 0))
        return lax.conv_general_dilated(inp, w, (stride, stride), "SAME",
                                        dimension_numbers=dn)

    def bn(inp, g, be, rm, rv):
        return (inp - rm) / jnp.sqrt(rv + EPS) * g + be

    c1 = conv(x, p["w1"]) + p["b1"]
    o1 = jax.nn.relu(bn(c1, p["g1"], p["be1"], p["rm1"], p["rv1"]))
    c2 = conv(o1, p["w2"]) + p["b2"]
    o2 = bn(c2, p["g2"], p["be2"], p["rm2"], p["rv2"])
    sc = bn(conv(x, p["ws"]), p["gs"], p["bes"], p["rms"], p["rvs"])
    out = jax.nn.relu(o2 + sc)
    return jnp.transpose(out, (0, 3, 1, 2))


# ---------------------------------------------------------------------------
# Deterministic parameter construction + test
# ---------------------------------------------------------------------------
def make_params(key, in_planes, out_planes):
    ks = jax.random.split(key, 16)
    n = lambda k, s, sc=0.1: sc * jax.random.normal(k, s, jnp.float32)
    return {
        "w1": n(ks[0], (out_planes, in_planes, 3, 3)),
        "b1": n(ks[1], (out_planes,)),
        "g1": 1.0 + n(ks[2], (out_planes,)),
        "be1": n(ks[3], (out_planes,)),
        "rm1": n(ks[4], (out_planes,)),
        "rv1": 0.5 + jnp.abs(n(ks[5], (out_planes,))),
        "w2": n(ks[6], (out_planes, out_planes, 3, 3)),
        "b2": n(ks[7], (out_planes,)),
        "g2": 1.0 + n(ks[8], (out_planes,)),
        "be2": n(ks[9], (out_planes,)),
        "rm2": n(ks[10], (out_planes,)),
        "rv2": 0.5 + jnp.abs(n(ks[11], (out_planes,))),
        "ws": n(ks[12], (out_planes, in_planes, 1, 1)),
        "gs": 1.0 + n(ks[13], (out_planes,)),
        "bes": n(ks[14], (out_planes,)),
        "rms": n(ks[15], (out_planes,)),
        "rvs": jnp.full((out_planes,), 0.8, jnp.float32),
    }


if __name__ == "__main__":
    B, Cin, Cout, H, W = 2, 4, 8, 16, 16
    key = jax.random.PRNGKey(0)
    kx, kp = jax.random.split(key)
    x = jax.random.normal(kx, (B, Cin, H, W), jnp.float32)  # NCHW like PyTorch
    params = make_params(kp, Cin, Cout)

    out = jax.block_until_ready(jax.jit(block_forward)(x, params))
    ref = jax.block_until_ready(block_reference(x, params))

    assert out.shape == (B, Cout, H, W), out.shape
    assert jnp.allclose(out, ref, atol=1e-4, rtol=1e-4), float(
        jnp.max(jnp.abs(out - ref)))
    print("KERNEL_OK")
</pallas_src>

<mosaic_0001>
module attributes {stable_mosaic.version = 11 : i64} {
  func.func @_block_kernel(%arg0: i32, %arg1: memref<9x256xf32, #tpu.memory_space<vmem>>, %arg2: memref<1x8x256xf32, #tpu.memory_space<vmem>>, %arg3: memref<8x72xf32, #tpu.memory_space<vmem>>, %arg4: memref<8x1xf32, #tpu.memory_space<vmem>>, %arg5: memref<8x80xf32, #tpu.memory_space<vmem>>, %arg6: memref<8x1xf32, #tpu.memory_space<vmem>>, %arg7: memref<1x8x256xf32, #tpu.memory_space<vmem>>) attributes {dimension_semantics = [#tpu.dimension_semantics<parallel>], iteration_bounds = array<i64: 2>, scalar_prefetch = 0 : i64, scratch_operands = 0 : i64, tpu.core_type = #tpu.core_type<tc>, window_params = [{pipeline_mode = #tpu.pipeline_mode<synchronous>, transform_indices = @transform_0, window_bounds = array<i64: 9, 256>}, {transform_indices = @transform_1, window_bounds = array<i64: 1, 8, 256>}, {pipeline_mode = #tpu.pipeline_mode<synchronous>, transform_indices = @transform_2, window_bounds = array<i64: 8, 72>}, {pipeline_mode = #tpu.pipeline_mode<synchronous>, transform_indices = @transform_3, window_bounds = array<i64: 8, 1>}, {pipeline_mode = #tpu.pipeline_mode<synchronous>, transform_indices = @transform_4, window_bounds = array<i64: 8, 80>}, {pipeline_mode = #tpu.pipeline_mode<synchronous>, transform_indices = @transform_5, window_bounds = array<i64: 8, 1>}, {transform_indices = @transform_6, window_bounds = array<i64: 1, 8, 256>}]} {
    %c0 = arith.constant 0 : index
    %c0_0 = arith.constant 0 : index
    %c0_1 = arith.constant 0 : index
    %0 = vector.load %arg2[%c0, %c0_0, %c0_1] : memref<1x8x256xf32, #tpu.memory_space<vmem>>, vector<1x8x256xf32>
    %1 = vector.shape_cast %0 : vector<1x8x256xf32> to vector<8x256xf32>
    %c0_2 = arith.constant 0 : index
    %c0_3 = arith.constant 0 : index
    %2 = vector.load %arg1[%c0_2, %c0_3] : memref<9x256xf32, #tpu.memory_space<vmem>>, vector<9x256xf32>
    %c0_4 = arith.constant 0 : index
    %c0_5 = arith.constant 0 : index
    %3 = vector.load %arg3[%c0_4, %c0_5] : memref<8x72xf32, #tpu.memory_space<vmem>>, vector<8x72xf32>
    %c17_i32 = arith.constant 17 : i32
    %4 = tpu.dynamic_rotate %1 by %c17_i32 dim 1 : vector<8x256xf32>, i32 -> vector<8x256xf32>
    %5 = vector.extract_strided_slice %2 {offsets = [0, 0], sizes = [1, 256], strides = [1, 1]} : vector<9x256xf32> to vector<1x256xf32>
    %6 = vector.broadcast %5 : vector<1x256xf32> to vector<8x256xf32>
    %7 = arith.mulf %4, %6 : vector<8x256xf32>
    %c16_i32 = arith.constant 16 : i32
    %8 = tpu.dynamic_rotate %1 by %c16_i32 dim 1 : vector<8x256xf32>, i32 -> vector<8x256xf32>
    %9 = vector.extract_strided_slice %2 {offsets = [1, 0], sizes = [1, 256], strides = [1, 1]} : vector<9x256xf32> to vector<1x256xf32>
    %10 = vector.broadcast %9 : vector<1x256xf32> to vector<8x256xf32>
    %11 = arith.mulf %8, %10 : vector<8x256xf32>
    %c15_i32 = arith.constant 15 : i32
    %12 = tpu.dynamic_rotate %1 by %c15_i32 dim 1 : vector<8x256xf32>, i32 -> vector<8x256xf32>
    %13 = vector.extract_strided_slice %2 {offsets = [2, 0], sizes = [1, 256], strides = [1, 1]} : vector<9x256xf32> to vector<1x256xf32>
    %14 = vector.broadcast %13 : vector<1x256xf32> to vector<8x256xf32>
    %15 = arith.mulf %12, %14 : vector<8x256xf32>
    %c1_i32 = arith.constant 1 : i32
    %16 = tpu.dynamic_rotate %1 by %c1_i32 dim 1 : vector<8x256xf32>, i32 -> vector<8x256xf32>
    %17 = vector.extract_strided_slice %2 {offsets = [3, 0], sizes = [1, 256], strides = [1, 1]} : vector<9x256xf32> to vector<1x256xf32>
    %18 = vector.broadcast %17 : vector<1x256xf32> to vector<8x256xf32>
    %19 = arith.mulf %16, %18 : vector<8x256xf32>
    %c255_i32 = arith.constant 255 : i32
    %20 = tpu.dynamic_rotate %1 by %c255_i32 dim 1 : vector<8x256xf32>, i32 -> vector<8x256xf32>
    %21 = vector.extract_strided_slice %2 {offsets = [5, 0], sizes = [1, 256], strides = [1, 1]} : vector<9x256xf32> to vector<1x256xf32>
    %22 = vector.broadcast %21 : vector<1x256xf32> to vector<8x256xf32>
    %23 = arith.mulf %20, %22 : vector<8x256xf32>
    %c241_i32 = arith.constant 241 : i32
    %24 = tpu.dynamic_rotate %1 by %c241_i32 dim 1 : vector<8x256xf32>, i32 -> vector<8x256xf32>
    %25 = vector.extract_strided_slice %2 {offsets = [6, 0], sizes = [1, 256], strides = [1, 1]} : vector<9x256xf32> to vector<1x256xf32>
    %26 = vector.broadcast %25 : vector<1x256xf32> to vector<8x256xf32>
    %27 = arith.mulf %24, %26 : vector<8x256xf32>
    %c240_i32 = arith.constant 240 : i32
    %28 = tpu.dynamic_rotate %1 by %c240_i32 dim 1 : vector<8x256xf32>, i32 -> vector<8x256xf32>
    %29 = vector.extract_strided_slice %2 {offsets = [7, 0], sizes = [1, 256], strides = [1, 1]} : vector<9x256xf32> to vector<1x256xf32>
    %30 = vector.broadcast %29 : vector<1x256xf32> to vector<8x256xf32>
    %31 = arith.mulf %28, %30 : vector<8x256xf32>
    %c239_i32 = arith.constant 239 : i32
    %32 = tpu.dynamic_rotate %1 by %c239_i32 dim 1 : vector<8x256xf32>, i32 -> vector<8x256xf32>
    %33 = vector.extract_strided_slice %2 {offsets = [8, 0], sizes = [1, 256], strides = [1, 1]} : vector<9x256xf32> to vector<1x256xf32>
    %34 = vector.broadcast %33 : vector<1x256xf32> to vector<8x256xf32>
    %35 = arith.mulf %32, %34 : vector<8x256xf32>
    %36 = tpu.concatenate %7, %11, %15, %19, %1, %23, %27, %31, %35 in 0 : vector<8x256xf32>, vector<8x256xf32>, vector<8x256xf32>, vector<8x256xf32>, vector<8x256xf32>, vector<8x256xf32>, vector<8x256xf32>, vector<8x256xf32>, vector<8x256xf32> -> vector<72x256xf32>
    %cst = arith.constant dense<0.000000e+00> : vector<8x256xf32>
    %37 = tpu.matmul %3, %36, %cst {dimension_numbers = #tpu.dot_dimension_numbers<[1], [0], [0], [1], [0, 0, 1, 1], [], []>} : vector<8x72xf32>, vector<72x256xf32>, vector<8x256xf32> -> vector<8x256xf32>
    %c0_6 = arith.constant 0 : index
    %c0_7 = arith.constant 0 : index
    %38 = vector.load %arg4[%c0_6, %c0_7] : memref<8x1xf32, #tpu.memory_space<vmem>>, vector<8x1xf32>
    %39 = vector.broadcast %38 : vector<8x1xf32> to vector<8x256xf32>
    %40 = arith.addf %37, %39 : vector<8x256xf32>
    %cst_8 = arith.constant 0.000000e+00 : f32
    %41 = vector.broadcast %cst_8 : f32 to vector<8x256xf32>
    %42 = arith.maximumf %40, %41 : vector<8x256xf32>
    %c17_i32_9 = arith.constant 17 : i32
    %43 = tpu.dynamic_rotate %42 by %c17_i32_9 dim 1 : vector<8x256xf32>, i32 -> vector<8x256xf32>
    %44 = vector.extract_strided_slice %2 {offsets = [0, 0], sizes = [1, 256], strides = [1, 1]} : vector<9x256xf32> to vector<1x256xf32>
    %45 = vector.broadcast %44 : vector<1x256xf32> to vector<8x256xf32>
    %46 = arith.mulf %43, %45 : vector<8x256xf32>
    %c16_i32_10 = arith.constant 16 : i32
    %47 = tpu.dynamic_rotate %42 by %c16_i32_10 dim 1 : vector<8x256xf32>, i32 -> vector<8x256xf32>
    %48 = vector.extract_strided_slice %2 {offsets = [1, 0], sizes = [1, 256], strides = [1, 1]} : vector<9x256xf32> to vector<1x256xf32>
    %49 = vector.broadcast %48 : vector<1x256xf32> to vector<8x256xf32>
    %50 = arith.mulf %47, %49 : vector<8x256xf32>
    %c15_i32_11 = arith.constant 15 : i32
    %51 = tpu.dynamic_rotate %42 by %c15_i32_11 dim 1 : vector<8x256xf32>, i32 -> vector<8x256xf32>
    %52 = vector.extract_strided_slice %2 {offsets = [2, 0], sizes = [1, 256], strides = [1, 1]} : vector<9x256xf32> to vector<1x256xf32>
    %53 = vector.broadcast %52 : vector<1x256xf32> to vector<8x256xf32>
    %54 = arith.mulf %51, %53 : vector<8x256xf32>
    %c1_i32_12 = arith.constant 1 : i32
    %55 = tpu.dynamic_rotate %42 by %c1_i32_12 dim 1 : vector<8x256xf32>, i32 -> vector<8x256xf32>
    %56 = vector.extract_strided_slice %2 {offsets = [3, 0], sizes = [1, 256], strides = [1, 1]} : vector<9x256xf32> to vector<1x256xf32>
    %57 = vector.broadcast %56 : vector<1x256xf32> to vector<8x256xf32>
    %58 = arith.mulf %55, %57 : vector<8x256xf32>
    %c255_i32_13 = arith.constant 255 : i32
    %59 = tpu.dynamic_rotate %42 by %c255_i32_13 dim 1 : vector<8x256xf32>, i32 -> vector<8x256xf32>
    %60 = vector.extract_strided_slice %2 {offsets = [5, 0], sizes = [1, 256], strides = [1, 1]} : vector<9x256xf32> to vector<1x256xf32>
    %61 = vector.broadcast %60 : vector<1x256xf32> to vector<8x256xf32>
    %62 = arith.mulf %59, %61 : vector<8x256xf32>
    %c241_i32_14 = arith.constant 241 : i32
    %63 = tpu.dynamic_rotate %42 by %c241_i32_14 dim 1 : vector<8x256xf32>, i32 -> vector<8x256xf32>
    %64 = vector.extract_strided_slice %2 {offsets = [6, 0], sizes = [1, 256], strides = [1, 1]} : vector<9x256xf32> to vector<1x256xf32>
    %65 = vector.broadcast %64 : vector<1x256xf32> to vector<8x256xf32>
    %66 = arith.mulf %63, %65 : vector<8x256xf32>
    %c240_i32_15 = arith.constant 240 : i32
    %67 = tpu.dynamic_rotate %42 by %c240_i32_15 dim 1 : vector<8x256xf32>, i32 -> vector<8x256xf32>
    %68 = vector.extract_strided_slice %2 {offsets = [7, 0], sizes = [1, 256], strides = [1, 1]} : vector<9x256xf32> to vector<1x256xf32>
    %69 = vector.broadcast %68 : vector<1x256xf32> to vector<8x256xf32>
    %70 = arith.mulf %67, %69 : vector<8x256xf32>
    %c239_i32_16 = arith.constant 239 : i32
    %71 = tpu.dynamic_rotate %42 by %c239_i32_16 dim 1 : vector<8x256xf32>, i32 -> vector<8x256xf32>
    %72 = vector.extract_strided_slice %2 {offsets = [8, 0], sizes = [1, 256], strides = [1, 1]} : vector<9x256xf32> to vector<1x256xf32>
    %73 = vector.broadcast %72 : vector<1x256xf32> to vector<8x256xf32>
    %74 = arith.mulf %71, %73 : vector<8x256xf32>
    %75 = tpu.concatenate %46, %50, %54, %58, %42, %62, %66, %70, %74 in 0 : vector<8x256xf32>, vector<8x256xf32>, vector<8x256xf32>, vector<8x256xf32>, vector<8x256xf32>, vector<8x256xf32>, vector<8x256xf32>, vector<8x256xf32>, vector<8x256xf32> -> vector<72x256xf32>
    %76 = tpu.concatenate %75, %1 in 0 : vector<72x256xf32>, vector<8x256xf32> -> vector<80x256xf32>
    %c0_17 = arith.constant 0 : index
    %c0_18 = arith.constant 0 : index
    %77 = vector.load %arg5[%c0_17, %c0_18] : memref<8x80xf32, #tpu.memory_space<vmem>>, vector<8x80xf32>
    %cst_19 = arith.constant dense<0.000000e+00> : vector<8x256xf32>
    %78 = tpu.matmul %77, %76, %cst_19 {dimension_numbers = #tpu.dot_dimension_numbers<[1], [0], [0], [1], [0, 0, 1, 1], [], []>} : vector<8x80xf32>, vector<80x256xf32>, vector<8x256xf32> -> vector<8x256xf32>
    %c0_20 = arith.constant 0 : index
    %c0_21 = arith.constant 0 : index
    %79 = vector.load %arg6[%c0_20, %c0_21] : memref<8x1xf32, #tpu.memory_space<vmem>>, vector<8x1xf32>
    %80 = vector.broadcast %79 : vector<8x1xf32> to vector<8x256xf32>
    %81 = arith.addf %78, %80 : vector<8x256xf32>
    %cst_22 = arith.constant 0.000000e+00 : f32
    %82 = vector.broadcast %cst_22 : f32 to vector<8x256xf32>
    %83 = arith.maximumf %81, %82 : vector<8x256xf32>
    %c0_23 = arith.constant 0 : index
    %c0_24 = arith.constant 0 : index
    %c0_25 = arith.constant 0 : index
    %84 = vector.load %arg7[%c0_23, %c0_24, %c0_25] : memref<1x8x256xf32, #tpu.memory_space<vmem>>, vector<1x8x256xf32>
    %85 = vector.shape_cast %84 : vector<1x8x256xf32> to vector<8x256xf32>
    %86 = vector.shape_cast %83 : vector<8x256xf32> to vector<1x8x256xf32>
    tpu.vector_store %arg7[%c0_23, %c0_24, %c0_25], %86 {strides = array<i32>} : memref<1x8x256xf32, #tpu.memory_space<vmem>>, vector<1x8x256xf32>,
    return
  }
  func.func @transform_0(%arg0: i32) -> (i32, i32) {
    %c0_i32 = arith.constant 0 : i32
    %c0_i32_0 = arith.constant 0 : i32
    %c0_i32_1 = arith.constant 0 : i32
    return %c0_i32, %c0_i32_0 : i32, i32
  }
  func.func @transform_1(%arg0: i32) -> (i32, i32, i32) {
    %c0_i32 = arith.constant 0 : i32
    %c0_i32_0 = arith.constant 0 : i32
    %c0_i32_1 = arith.constant 0 : i32
    return %arg0, %c0_i32, %c0_i32_0 : i32, i32, i32
  }
  func.func @transform_2(%arg0: i32) -> (i32, i32) {
    %c0_i32 = arith.constant 0 : i32
    %c0_i32_0 = arith.constant 0 : i32
    %c0_i32_1 = arith.constant 0 : i32
    return %c0_i32, %c0_i32_0 : i32, i32
  }
  func.func @transform_3(%arg0: i32) -> (i32, i32) {
    %c0_i32 = arith.constant 0 : i32
    %c0_i32_0 = arith.constant 0 : i32
    %c0_i32_1 = arith.constant 0 : i32
    return %c0_i32, %c0_i32_0 : i32, i32
  }
  func.func @transform_4(%arg0: i32) -> (i32, i32) {
    %c0_i32 = arith.constant 0 : i32
    %c0_i32_0 = arith.constant 0 : i32
    %c0_i32_1 = arith.constant 0 : i32
    return %c0_i32, %c0_i32_0 : i32, i32
  }
  func.func @transform_5(%arg0: i32) -> (i32, i32) {
    %c0_i32 = arith.constant 0 : i32
    %c0_i32_0 = arith.constant 0 : i32
    %c0_i32_1 = arith.constant 0 : i32
    return %c0_i32, %c0_i32_0 : i32, i32
  }
  func.func @transform_6(%arg0: i32) -> (i32, i32, i32) {
    %c0_i32 = arith.constant 0 : i32
    %c0_i32_0 = arith.constant 0 : i32
    %c0_i32_1 = arith.constant 0 : i32
    return %arg0, %c0_i32, %c0_i32_0 : i32, i32, i32
  }
}

</mosaic_0001>

<bundles_post_ra>
// kernel: block_forward.1
= control target key start
LH: loop header
LB: loop body
LE: loop exit
PB: predicated region body
PF: predicated region fallthrough
CT: control target
= control target key end

     0   :  { %s810_s21 = smov 0   ;;  %s1090_s0 = inlined_call_operand.vmem [shape: f32[9,256], index: 0, kind: input, shape index: {}]   ;;  %s1091_s1 = inlined_call_operand.vmem [shape: f32[2,8,256], index: 1, kind: input, shape index: {}]   ;;  %s1092_s2 = inlined_call_operand.vmem [shape: f32[8,72], index: 2, kind: input, shape index: {}]   ;;  %s1093_s3 = inlined_call_operand.vmem [shape: f32[8,1], index: 3, kind: input, shape index: {}]   ;;  %s1094_s4 = inlined_call_operand.vmem [shape: f32[8,80], index: 4, kind: input, shape index: {}]   ;;  %s1095_s5 = inlined_call_operand.vmem [shape: f32[8,1], index: 5, kind: input, shape index: {}]   ;;  %s1096_s6 = inlined_call_operand.vmem [shape: f32[2,8,256], index: 6, kind: output, shape index: {}]  }
   0x1 LB: > { %s685_s22 = sadd.s32 4294967295, %s763_s21   ;;  %p689_p0 = scmp.ge.s32.totalorder %s763_s21, 1  ;;  %s763_s21 = sphi %s810_s21, %s16_s21  }
   0x2   : > { %p212_p1 = scmp.lt.s32.totalorder %s763_s21, 3 }
   0x4   : > { %p213_p2 = pnand %p689_p0, %p212_p1 }
   0x5   : > { %p242_p3 = scmp.lt.s32.totalorder (!%p213_p2), %s685_s22, 1  ;;  %s765_s27 = smov (!%p213_p2), 16   ;;  %v771_v2 = vmov (!%p213_p2), 0.0   ;;  %v772_v3 = vmov (!%p213_p2), 0   ;;  %v397_v4 = vld [vmem:[%s1093_s3] sm:$0xff] (!%p213_p2)  ;;  %v263_v5 = vlaneseq (!%p213_p2)  ;;  %v879_v11 = vld [vmem:[%s1090_s0 + $0x8] sm:$0xff] (!%p213_p2) }
   0x6   : > { %216 = sbr.rel (%p213_p2) target bundleno = 757 (0x2f5), region = 44  ;;  %s766_s28 = smov (!%p213_p2), 17   ;;  %471 = vmatprep.mubr.f32.mxu0 (!%p213_p2), %v771_v2  ;;  %619 = vmatprep.mubr.f32.mxu1 (!%p213_p2), %v771_v2  ;;  %v874_v10 = vld [vmem:[%s1090_s0] sm:$0xff] (!%p213_p2)  ;;  %vm403_vm8 = vcmask (!%p213_p2), 588800   ;;  %vm551_vm9 = vcmask (!%p213_p2), 654336  }
   0x7   : > { %s767_s29 = smov (!%p213_p2), 15   ;;  %s768_s30 = smov (!%p213_p2), 1   ;;  %756 = vset.pattern.permute.xlu0 (!%p213_p2), %v772_v3  ;;  %v865_v6 = vshrl.u32 (!%p213_p2), %v263_v5, 7  ;;  %v867_v7 = vand.u32 (!%p213_p2), 127, %v263_v5 }
   0x8   : > { %s769_s7 = smov (!%p213_p2), 127   ;;  %s770_s8 = smov (!%p213_p2), 113  }
   0x9   : > { %s773_s9 = smov (!%p213_p2), 112   ;;  %s774_s10 = smov (!%p213_p2), 111   ;;  %v287_v8 = vsub.s32 (!%p213_p2), 1, %v865_v6  ;;  %v270_v9 = vsub.s32 (!%p213_p2), 0, %v865_v6  ;;  %vm282_vm0 = vcmp.lt.s32.totalorder (!%p213_p2), %v867_v7, 16  ;;  %vm265_vm1 = vcmp.lt.s32.totalorder (!%p213_p2), %v867_v7, 17 }
   0xa   : > { %v304_v20 = vsub.s32 (!%p213_p2), 2, %v865_v6  ;;  %v321_v21 = vsub.s32 (!%p213_p2), 3, %v865_v6  ;;  %vm299_vm2 = vcmp.lt.s32.totalorder (!%p213_p2), %v867_v7, 15  ;;  %vm316_vm3 = vcmp.lt.s32.totalorder (!%p213_p2), %v867_v7, 1 }
   0xb   : > { %v884_v14 = vrot.slane (!%p213_p2), %v874_v10, %v287_v8  ;;  %v887_v15 = vrot.slane (!%p213_p2), %v874_v10, %v270_v9  ;;  %v890_v16 = vrot.slane (!%p213_p2), %v879_v11, %v270_v9  ;;  %v893_v17 = vrot.slane (!%p213_p2), %v879_v11, %v287_v8 }
   0xc   : > { %v338_v34 = vsub.s32 (!%p213_p2), 5, %v865_v6  ;;  %v913_v35 = vrot.slane (!%p213_p2), %v874_v10, %v304_v20  ;;  %v916_v36 = vrot.slane (!%p213_p2), %v879_v11, %v304_v20  ;;  %v919_v37 = vrot.slane (!%p213_p2), %v874_v10, %v321_v21 }
   0xd   : > { %s1098_s22 = smov (!%p242_p3, %s685_s22), 1  ;;  %v922_v38 = vrot.slane %v879_v11, %v321_v21  ;;  %vm333_vm4 = vcmp.lt.s32.totalorder %v867_v7, 127  ;;  %v355_v57 = vsub.s32 6, %v865_v6  ;;  %v372_v60 = vsub.s32 7, %v865_v6 }
   0xe   : > { %s700_s23 = sshll.u32 %s1098_s22, 4  ;;  %v934_v45 = vrot.slane %v874_v10, %v338_v34  ;;  %v937_v46 = vrot.slane %v879_v11, %v338_v34  ;;  %vm350_vm5 = vcmp.lt.s32.totalorder %v867_v7, 113  ;;  %vm367_vm6 = vcmp.lt.s32.totalorder %v867_v7, 112 }
   0xf   : > { %s246_s26 = scalar_lea.vmem %s1091_s1, %s700_s23  ;;  %v955_v3 = vrot.slane %v874_v10, %v355_v57  ;;  %v962_v5 = vrot.slane %v874_v10, %v372_v60  ;;  %v965_v6 = vrot.slane %v879_v11, %v372_v60  ;;  %vm384_vm7 = vcmp.lt.s32.totalorder %v867_v7, 111 }
  0x10   : > { %v826_v0 = vld [vmem:[%s246_s26] sm:$0xff]  ;;  %v832_v1 = vld [vmem:[%s246_s26 + $0x8] sm:$0xff] }
  0x11   : > { %278 = vrot.lane.b32.xlu1 %v826_v0, %s765_s27  ;;  %259 = vrot.lane.b32.xlu0 %v826_v0, %s766_s28 }
  0x15   : > { %280 = vrot.lane.b32.xlu1 %v832_v1, %s765_s27  ;;  %261 = vrot.lane.b32.xlu0 %v832_v1, %s766_s28 }
  0x19   : > { %297 = vrot.lane.b32.xlu1 %v832_v1, %s767_s29  ;;  %295 = vrot.lane.b32.xlu0 %v826_v0, %s767_s29 }
  0x1d   : > { %314 = vrot.lane.b32.xlu1 %v832_v1, %s768_s30  ;;  %312 = vrot.lane.b32.xlu0 %v826_v0, %s768_s30 }
  0x21   : > { %331 = vrot.lane.b32.xlu1 %v832_v1, %s769_s7  ;;  %329 = vrot.lane.b32.xlu0 %v826_v0, %s769_s7 }
  0x25   : > { %348 = vrot.lane.b32.xlu1 %v832_v1, %s770_s8  ;;  %346 = vrot.lane.b32.xlu0 %v826_v0, %s770_s8 }
  0x29   : > { %365 = vrot.lane.b32.xlu1 %v832_v1, %s773_s9  ;;  %363 = vrot.lane.b32.xlu0 %v826_v0, %s773_s9 }
  0x2d   : > { %382 = vrot.lane.b32.xlu1 %v832_v1, %s774_s10  ;;  %380 = vrot.lane.b32.xlu0 %v826_v0, %s774_s10 }
  0x31   : > { %400 = vperm.xlu0 %756, %v397_v4   ;;  %v958_v4 = vrot.slane %v879_v11, %v355_v57 }
  0x83   : > { %v279_v12 = vpop.permute.xlu1 %278  ;;  %v260_v13 = vpop.permute.xlu0 %259 }
  0x87   : > { %v281_v18 = vpop.permute.xlu1 %280  ;;  %v262_v19 = vpop.permute.xlu0 %261 }
  0x88   : > { %v283_v22 = vsel %vm282_vm0, %v279_v12, %v281_v18  ;;  %v284_v23 = vsel %vm282_vm0, %v281_v18, %v279_v12  ;;  %v266_v24 = vsel %vm265_vm1, %v260_v13, %v262_v19  ;;  %v267_v25 = vsel %vm265_vm1, %v262_v19, %v260_v13 }
  0x89   : > { %v293_v26 = vmul.f32 %v884_v14, %v284_v23  ;;  %v276_v27 = vmul.f32 %v887_v15, %v267_v25  ;;  %v277_v28 = vmul.f32 %v890_v16, %v266_v24  ;;  %v294_v29 = vmul.f32 %v893_v17, %v283_v22  ;;  %v983_v22 = vld [vmem:[%s1090_s0 + $0x18] ss:$0 sm:$0xff]  ;;  %v988_v25 = vld [vmem:[%s1090_s0 + $0x10] ss:$0 sm:$0xff] }
  0x8b   : > { %v298_v30 = vpop.permute.xlu1 %297  ;;  %v296_v31 = vpop.permute.xlu0 %295  ;;  %v702_v32 = vpack.c.bf16 %v294_v29, %v277_v28  ;;  %v704_v33 = vpack.c.bf16 %v293_v26, %v276_v27 }
  0x8c   : > { %v300_v39 = vsel %vm299_vm2, %v296_v31, %v298_v30  ;;  %v301_v40 = vsel %vm299_vm2, %v298_v30, %v296_v31 }
  0x8d   : > { %703 = vmatprep.subr.bf16.mxu0 %v702_v32  ;;  %v310_v47 = vmul.f32 %v913_v35, %v301_v40  ;;  %v311_v48 = vmul.f32 %v916_v36, %v300_v39  ;;  %v258_v32 = vld [vmem:[%s1092_s2] sm:$0xff] }
  0x8e   : > { %705 = vmatpush1.bf16.msra.mxu0 %v704_v33 }
  0x8f   : > { %v315_v41 = vpop.permute.xlu1 %314  ;;  %v313_v42 = vpop.permute.xlu0 %312 }
  0x90   : > { %v317_v43 = vsel %vm316_vm3, %v313_v42, %v315_v41  ;;  %v318_v44 = vsel %vm316_vm3, %v315_v41, %v313_v42 }
  0x91   : > { %v327_v49 = vmul.f32 %v919_v37, %v318_v44  ;;  %v328_v50 = vmul.f32 %v922_v38, %v317_v43  ;;  %v545_v44 = vld [vmem:[%s1095_s5] sm:$0xff] }
  0x93   : > { %v332_v51 = vpop.permute.xlu1 %331  ;;  %v330_v52 = vpop.permute.xlu0 %329  ;;  %v706_v53 = vpack.c.bf16 %v328_v50, %v311_v48  ;;  %v708_v54 = vpack.c.bf16 %v327_v49, %v310_v47 }
  0x94   : > { %v334_v55 = vsel %vm333_vm4, %v330_v52, %v332_v51  ;;  %v335_v56 = vsel %vm333_vm4, %v332_v51, %v330_v52 }
  0x95   : > { %v344_v58 = vmul.f32 %v934_v45, %v334_v55  ;;  %v345_v59 = vmul.f32 %v937_v46, %v335_v56  ;;  %707 = vmatprep.subr.bf16.mxu0 %v706_v53 }
  0x96   : > { %709 = vmatpush1.bf16.msra.mxu0 %v708_v54 }
  0x97   : > { %v349_v61 = vpop.permute.xlu1 %348  ;;  %v347_v62 = vpop.permute.xlu0 %346  ;;  %v710_v63 = vpack.c.bf16 %v345_v59, %v832_v1  ;;  %v712_v2 = vpack.c.bf16 %v344_v58, %v826_v0 }
  0x98   : > { %v351_v8 = vsel %vm350_vm5, %v347_v62, %v349_v61  ;;  %v352_v9 = vsel %vm350_vm5, %v349_v61, %v347_v62 }
  0x99   : > { %711 = vmatprep.subr.bf16.mxu0 %v710_v63  ;;  %v361_v10 = vmul.f32 %v955_v3, %v351_v8  ;;  %v362_v11 = vmul.f32 %v958_v4, %v352_v9 }
  0x9a   : > { %713 = vmatpush1.bf16.msra.mxu0 %v712_v2 }
  0x9b   : > { %v366_v12 = vpop.permute.xlu1 %365  ;;  %v364_v13 = vpop.permute.xlu0 %363 }
  0x9c   : > { %v368_v18 = vsel %vm367_vm6, %v364_v13, %v366_v12  ;;  %v369_v19 = vsel %vm367_vm6, %v366_v12, %v364_v13 }
  0x9d   : > { %v378_v20 = vmul.f32 %v962_v5, %v368_v18  ;;  %v379_v21 = vmul.f32 %v965_v6, %v369_v19 }
  0x9f   : > { %v383_v23 = vpop.permute.xlu1 %382  ;;  %v714_v24 = vpack.c.bf16 %v379_v21, %v362_v11  ;;  %v381_v26 = vpop.permute.xlu0 %380  ;;  %v716_v27 = vpack.c.bf16 %v378_v20, %v361_v10 }
  0xa0   : > { %v385_v28 = vsel %vm384_vm7, %v381_v26, %v383_v23  ;;  %v386_v29 = vsel %vm384_vm7, %v383_v23, %v381_v26 }
  0xa1   : > { %715 = vmatprep.subr.bf16.mxu0 %v714_v24  ;;  %v396_v30 = vmul.f32 %v983_v22, %v386_v29  ;;  %v395_v31 = vmul.f32 %v988_v25, %v385_v28 }
  0xa2   : > { %717 = vmatpush1.bf16.msra.mxu0 %v716_v27 }
  0xa3   : > { %423 = vmatprep.subr.mxu0 %v396_v30 }
  0xa6   : > { %424 = vmatpush1.msra.mxu0 %v395_v31 }
  0xa7   : > { %696 = vmatmul.mubr.msk.f32.vlgmr.msra.gmra.mrb[0].mxu0 %vm403_vm8, %v258_v32 }
  0xb0   : > { %v401_v33 = vpop.permute.xlu0 %400 }
 0x17a   : > { %v473_v34 = vpop.f32.mrb[0].mxu0 }
 0x17b   : > { %v474_v39 = vadd.f32 %v473_v34, %v401_v33  ;;  %v475_v40 = vpop.f32.mrb[1].mxu0 }
 0x17c   : > { %v476_v42 = vadd.f32 %v475_v40, %v401_v33 }
 0x17d   : > { %v999_v41 = vmax.f32 %v474_v39, 0.0 }
 0x17e   : > { %v479_v43 = vmax.f32 %v476_v42, 0.0 }
 0x17f   : > { %488 = vrot.lane.b32.xlu0 %v999_v41, %s765_s27  ;;  %480 = vrot.lane.b32.xlu1 %v999_v41, %s766_s28 }
 0x183   : > { %496 = vrot.lane.b32.xlu0 %v999_v41, %s767_s29  ;;  %482 = vrot.lane.b32.xlu1 %v479_v43, %s766_s28 }
 0x187   : > { %504 = vrot.lane.b32.xlu0 %v999_v41, %s768_s30  ;;  %490 = vrot.lane.b32.xlu1 %v479_v43, %s765_s27 }
 0x18b   : > { %512 = vrot.lane.b32.xlu0 %v999_v41, %s769_s7  ;;  %498 = vrot.lane.b32.xlu1 %v479_v43, %s767_s29 }
 0x18f   : > { %520 = vrot.lane.b32.xlu0 %v999_v41, %s770_s8  ;;  %506 = vrot.lane.b32.xlu1 %v479_v43, %s768_s30 }
 0x193   : > { %528 = vrot.lane.b32.xlu0 %v999_v41, %s773_s9  ;;  %514 = vrot.lane.b32.xlu1 %v479_v43, %s769_s7 }
 0x197   : > { %536 = vrot.lane.b32.xlu0 %v999_v41, %s774_s10  ;;  %522 = vrot.lane.b32.xlu1 %v479_v43, %s770_s8  ;;  %s251_s8 = scalar_lea.vmem %s1096_s6, %s700_s23 }
 0x19b   : > { %548 = vperm.xlu0 %756, %v545_v44   ;;  %530 = vrot.lane.b32.xlu1 %v479_v43, %s773_s9 }
 0x19f   : > { %538 = vrot.lane.b32.xlu1 %v479_v43, %s774_s10 }
 0x1f1   : > { %v489_v47 = vpop.permute.xlu0 %488  ;;  %v481_v48 = vpop.permute.xlu1 %480 }
 0x1f5   : > { %v497_v49 = vpop.permute.xlu0 %496  ;;  %v483_v50 = vpop.permute.xlu1 %482 }
 0x1f6   : > { %v484_v51 = vsel %vm265_vm1, %v481_v48, %v483_v50  ;;  %v485_v52 = vsel %vm265_vm1, %v483_v50, %v481_v48 }
 0x1f7   : > { %v486_v57 = vmul.f32 %v485_v52, %v887_v15  ;;  %v487_v59 = vmul.f32 %v484_v51, %v890_v16 }
 0x1f9   : > { %v505_v53 = vpop.permute.xlu0 %504  ;;  %v491_v54 = vpop.permute.xlu1 %490 }
 0x1fa   : > { %v492_v55 = vsel %vm282_vm0, %v489_v47, %v491_v54  ;;  %v493_v56 = vsel %vm282_vm0, %v491_v54, %v489_v47 }
 0x1fb   : > { %v494_v58 = vmul.f32 %v493_v56, %v884_v14  ;;  %v495_v60 = vmul.f32 %v492_v55, %v893_v17 }
 0x1fd   : > { %v499_v61 = vpop.permute.xlu1 %498  ;;  %v718_v62 = vpack.c.bf16 %v495_v60, %v487_v59  ;;  %v720_v63 = vpack.c.bf16 %v494_v58, %v486_v57  ;;  %v513_v2 = vpop.permute.xlu0 %512 }
 0x1fe   : > { %v500_v8 = vsel %vm299_vm2, %v497_v49, %v499_v61  ;;  %v501_v9 = vsel %vm299_vm2, %v499_v61, %v497_v49 }
 0x1ff   : > { %719 = vmatprep.subr.bf16.mxu1 %v718_v62  ;;  %v502_v16 = vmul.f32 %v501_v9, %v913_v35  ;;  %v503_v17 = vmul.f32 %v500_v8, %v916_v36 }
 0x200   : > { %721 = vmatpush1.bf16.msra.mxu1 %v720_v63 }
 0x201   : > { %v507_v12 = vpop.permute.xlu1 %506  ;;  %v521_v19 = vpop.permute.xlu0 %520 }
 0x202   : > { %v508_v14 = vsel %vm316_vm3, %v505_v53, %v507_v12  ;;  %v509_v15 = vsel %vm316_vm3, %v507_v12, %v505_v53 }
 0x203   : > { %v510_v13 = vmul.f32 %v509_v15, %v919_v37  ;;  %v511_v18 = vmul.f32 %v508_v14, %v922_v38 }
 0x205   : > { %v515_v10 = vpop.permute.xlu1 %514  ;;  %v722_v11 = vpack.c.bf16 %v511_v18, %v503_v17  ;;  %v724_v20 = vpack.c.bf16 %v510_v13, %v502_v16  ;;  %v529_v26 = vpop.permute.xlu0 %528 }
 0x206   : > { %v516_v21 = vsel %vm333_vm4, %v513_v2, %v515_v10  ;;  %v517_v23 = vsel %vm333_vm4, %v515_v10, %v513_v2 }
 0x207   : > { %v518_v24 = vmul.f32 %v516_v21, %v934_v45  ;;  %v519_v35 = vmul.f32 %v517_v23, %v937_v46  ;;  %723 = vmatprep.subr.bf16.mxu1 %v722_v11 }
 0x208   : > { %725 = vmatpush1.bf16.msra.mxu1 %v724_v20 }
 0x209   : > { %v523_v36 = vpop.permute.xlu1 %522  ;;  %v726_v37 = vpack.c.bf16 %v519_v35, %v479_v43  ;;  %v728_v38 = vpack.c.bf16 %v518_v24, %v999_v41  ;;  %v537_v34 = vpop.permute.xlu0 %536 }
 0x20a   : > { %v524_v27 = vsel %vm350_vm5, %v521_v19, %v523_v36  ;;  %v525_v28 = vsel %vm350_vm5, %v523_v36, %v521_v19 }
 0x20b   : > { %727 = vmatprep.subr.bf16.mxu1 %v726_v37  ;;  %v526_v30 = vmul.f32 %v524_v27, %v955_v3  ;;  %v527_v31 = vmul.f32 %v525_v28, %v958_v4 }
 0x20c   : > { %729 = vmatpush1.bf16.msra.mxu1 %v728_v38 }
 0x20d   : > { %v531_v29 = vpop.permute.xlu1 %530 }
 0x20e   : > { %v532_v45 = vsel %vm367_vm6, %v529_v26, %v531_v29  ;;  %v533_v46 = vsel %vm367_vm6, %v531_v29, %v529_v26 }
 0x20f   : > { %v534_v32 = vmul.f32 %v532_v45, %v962_v5  ;;  %v535_v33 = vmul.f32 %v533_v46, %v965_v6  ;;  %v544_v6 = vld [vmem:[%s1094_s4] sm:$0xff] }
 0x211   : > { %v539_v39 = vpop.permute.xlu1 %538  ;;  %v730_v40 = vpack.c.bf16 %v535_v33, %v527_v31  ;;  %v732_v41 = vpack.c.bf16 %v534_v32, %v526_v30 }
 0x212   : > { %v540_v42 = vsel %vm384_vm7, %v537_v34, %v539_v39  ;;  %v541_v43 = vsel %vm384_vm7, %v539_v39, %v537_v34 }
 0x213   : > { %v542_v44 = vmul.f32 %v988_v25, %v540_v42  ;;  %v543_v3 = vmul.f32 %v983_v22, %v541_v43  ;;  %731 = vmatprep.subr.bf16.mxu1 %v730_v40 }
 0x214   : > { %733 = vmatpush1.bf16.msra.mxu1 %v732_v41 }
 0x215   : > { %v734_v4 = vpack.c.bf16 %v832_v1, %v543_v3  ;;  %v736_v5 = vpack.c.bf16 %v826_v0, %v542_v44 }
 0x217   : > { %735 = vmatprep.subr.bf16.mxu1 %v734_v4 }
 0x218   : > { %737 = vmatpush1.bf16.msra.mxu1 %v736_v5 }
 0x21a   : > { %v549_v7 = vpop.permute.xlu0 %548 }
 0x21b   : > { %697 = vmatmul.mubr.msk.f32.vlgmr.msra.gmra.mrb[0].mxu1 %vm551_vm9, %v544_v6 }
 0x2ee   : > { %v621_v47 = vpop.f32.mrb[0].mxu1 }
 0x2ef   : > { %v622_v48 = vadd.f32 %v621_v47, %v549_v7  ;;  %v623_v25 = vpop.f32.mrb[1].mxu1 }
 0x2f0   : > { %v624_v1 = vadd.f32 %v623_v25, %v549_v7 }
 0x2f1   : > { %v626_v22 = vmax.f32 %v622_v48, 0.0 }
 0x2f2   : > { %v627_v0 = vmax.f32 %v624_v1, 0.0 }
 0x2f3   : > { %628 = vst [vmem:[%s251_s8] sm:$0xff] %v626_v22 }
 0x2f4   : > { %629 = vst [vmem:[%s251_s8 + $0x8] sm:$0xff] %v627_v0 }
 0x2f5 PF: > { %s16_s21 = sadd.s32 1, %s763_s21  }
 0x2f6   : > { %p13_p4 = scmp.ge.s32.totalorder %s16_s21, 4  }
 0x2f8   :  { %15 = sbr.rel (!%p13_p4) target bundleno = 1 (0x1), region = 74 }

</bundles_post_ra>
